<compile_context>
chip_gen: v7x
topology: tpu7x:2x2x1
jax: 0.10.0
libtpu: 0.0.40
codegen_flags: <defaults>
</compile_context>

<pallas_src>
import functools

import jax
import jax.numpy as jnp
from jax.experimental import pallas as pl
from jax.experimental.pallas import tpu as pltpu

EPS = 1e-8


def _round_up(x, m):
    return ((x + m - 1) // m) * m


def _attention_kernel(w_att_ref, b_att_ref, e_t_ref, d_ref, mask_ref, out_ref,
                      scores_ref, *, row_chunk, lane_chunk, transc_dtype):
    """One (batch, L_d-tile) grid step.

    w_att_ref : (n_att,)          SMEM
    b_att_ref : (1,)              SMEM
    e_t_ref   : (n_att, L_e)      VMEM   encoder projection, L_e on lanes
    d_ref     : (TILE_LD, n_att)  VMEM   decoder projection tile
    mask_ref  : (1, L_e)          VMEM
    out_ref   : (TILE_LD, L_e)    VMEM
    scores_ref: (TILE_LD, L_e)    VMEM scratch (only used when chunking)
    """
    tile_ld, l_e = out_ref.shape
    n_att = d_ref.shape[1]
    f32 = jnp.float32
    b_att = b_att_ref[0]

    def accum(d_rows, e_cols, rows, cols):
        # d_rows: (rows, n_att)  e_cols: (n_att, cols)
        acc = jnp.full((rows, cols), b_att, dtype=f32)
        for a in range(n_att):  # small static feature count -> unrolled
            pre = d_rows[:, a:a + 1] + e_cols[a:a + 1, :]        # (rows, cols)
            if transc_dtype != f32:
                t = jnp.tanh(pre.astype(transc_dtype)).astype(f32)   # bf16 EUP path
            else:
                t = jnp.tanh(pre)                                     # f32 EUP path
            acc = acc + w_att_ref[a] * t
        return acc

    single_chunk = (row_chunk >= tile_ld) and (lane_chunk >= l_e)
    if single_chunk:
        # Whole tile fits comfortably in vregs: no scratch traffic at all.
        scores = accum(d_ref[...], e_t_ref[...], tile_ld, l_e)
    else:
        # Chunked accumulation: each chunk accumulator stays in vregs across the
        # n_att feature loop; exactly one store pass over the scores block.
        for c0 in range(0, l_e, lane_chunk):
            c1 = min(c0 + lane_chunk, l_e)
            e_cols = e_t_ref[:, c0:c1]                           # (n_att, cw)
            for r0 in range(0, tile_ld, row_chunk):
                r1 = min(r0 + row_chunk, tile_ld)
                scores_ref[r0:r1, c0:c1] = accum(
                    d_ref[r0:r1, :], e_cols, r1 - r0, c1 - c0)
        scores = scores_ref[...]

    # Softmax over L_e fused with the post-softmax mask renormalization:
    #   softmax(s)*mask / (sum(softmax(s)*mask) + EPS)  ==  exm / (sum(exm) + EPS*z)
    m = jnp.max(scores, axis=-1, keepdims=True)                  # (TILE_LD, 1)
    ex = jnp.exp(scores - m)
    z = jnp.sum(ex, axis=-1, keepdims=True)                      # softmax denom
    exm = ex * mask_ref[...]                                     # (1, L_e) bcast
    s = jnp.sum(exm, axis=-1, keepdims=True)
    inv = 1.0 / (s + EPS * z)                                    # exact VPU divide
    out_ref[...] = (exm * inv).astype(out_ref.dtype)


def attention_pallas(h_e, h_d, mask, params, *, tile_ld=256,
                     use_bf16_transcendentals=False, out_dtype=jnp.float32):
    """h_e: (B, L_e, n_enc); h_d: (B, L_d, n_dec); mask: (B, L_e).

    Returns (B, L_d, L_e) attention weights in `out_dtype`.
    """
    B, L_e, _ = h_e.shape
    _, L_d, _ = h_d.shape
    w_en, b_en, w_de, w_att, b_att = params
    n_att = w_en.shape[0]
    f32 = jnp.float32

    h_e = h_e.astype(f32)
    h_d = h_d.astype(f32)
    w_en = jnp.asarray(w_en, f32)
    b_en = jnp.asarray(b_en, f32)
    w_de = jnp.asarray(w_de, f32)
    w_att_s = jnp.asarray(w_att, f32).reshape(n_att)
    b_att_s = jnp.asarray(b_att, f32).reshape(1)

    # Hoisted projections (tiny MXU matmuls, done once by XLA).  The encoder
    # projection is produced directly in (B, n_att, L_e) layout so no separate
    # HBM transpose pass is needed.
    e_t = jnp.einsum("ae,ble->bal", w_en, h_e) + b_en[:, None]   # (B, n_att, L_e)
    d = h_d @ w_de.T                                             # (B, L_d, n_att)
    mask3 = mask.astype(f32)[:, None, :]                         # (B, 1, L_e)

    out_itemsize = jnp.dtype(out_dtype).itemsize

    # ---- L_d tile selection ------------------------------------------------
    tile_ld = max(8, _round_up(int(tile_ld), 8))
    TILE_LD = L_d if L_d <= tile_ld else tile_ld
    # Megacore occupancy (v7x has 2 TCs sharing the parallel grid axes): make
    # sure there are at least 2 programs when the batch is 1.
    if B == 1 and L_d >= 16 and TILE_LD >= L_d:
        TILE_LD = _round_up(pl.cdiv(L_d, 2), 8)

    def _vmem_bytes(t):
        blocks = 2 * (n_att * L_e * 4          # e^T (double-buffered)
                      + t * n_att * 4          # d tile
                      + L_e * 4                # mask row
                      + t * L_e * out_itemsize)  # output tile
        scratch = t * _round_up(L_e, 128) * 4  # scores scratch
        return blocks + scratch

    BLOCK_BUDGET = 16 << 20          # keeps v7x's 64 MiB VMEM comfortable
    while _vmem_bytes(TILE_LD) > BLOCK_BUDGET and TILE_LD > 8:
        TILE_LD = max(8, _round_up(TILE_LD // 2, 8))
    vmem_limit = int(min(_vmem_bytes(TILE_LD) + (16 << 20), 48 << 20))

    # ---- chunk sizes so each chunk accumulator stays in vregs ---------------
    LANE_CHUNK = int(min(_round_up(L_e, 128), 512))
    ROW_CHUNK = max(8, (((64 * 1024) // (LANE_CHUNK * 4)) // 8) * 8)
    ROW_CHUNK = int(min(ROW_CHUNK, TILE_LD))

    transc_dtype = jnp.bfloat16 if use_bf16_transcendentals else f32

    grid = (B, int(pl.cdiv(L_d, TILE_LD)))
    grid_spec = pltpu.PrefetchScalarGridSpec(
        num_scalar_prefetch=0,
        grid=grid,
        in_specs=[
            pl.BlockSpec(memory_space=pltpu.MemorySpace.SMEM),             # w_att
            pl.BlockSpec(memory_space=pltpu.MemorySpace.SMEM),             # b_att
            pl.BlockSpec((None, n_att, L_e), lambda b, t: (b, 0, 0)),      # e^T
            pl.BlockSpec((None, TILE_LD, n_att), lambda b, t: (b, t, 0)),  # d
            pl.BlockSpec((None, 1, L_e), lambda b, t: (b, 0, 0)),          # mask
        ],
        out_specs=pl.BlockSpec((None, TILE_LD, L_e), lambda b, t: (b, t, 0)),
        scratch_shapes=[pltpu.VMEM((TILE_LD, L_e), f32)],
    )

    return pl.pallas_call(
        functools.partial(_attention_kernel,
                          row_chunk=ROW_CHUNK,
                          lane_chunk=LANE_CHUNK,
                          transc_dtype=transc_dtype),
        out_shape=jax.ShapeDtypeStruct((B, L_d, L_e), out_dtype),
        grid_spec=grid_spec,
        compiler_params=pltpu.CompilerParams(
            dimension_semantics=("parallel", "parallel"),
            vmem_limit_bytes=vmem_limit,
        ),
    )(w_att_s, b_att_s, e_t, d, mask3)


def attention_reference(h_e, h_d, mask, params):
    """Pure-JAX reference matching the PyTorch forward exactly."""
    w_en, b_en, w_de, w_att, b_att = params
    e = h_e @ w_en.T + b_en                                     # (B, L_e, n_att)
    d = h_d @ w_de.T                                            # (B, L_d, n_att)
    act = jnp.tanh(d[:, :, None, :] + e[:, None, :, :])         # (B, L_d, L_e, n_att)
    scores = jnp.einsum("bdea,a->bde", act, w_att.reshape(-1)) + b_att.reshape(())
    sm = jax.nn.softmax(scores, axis=2)
    masked = sm * mask[:, None, :]
    return masked / (jnp.sum(masked, axis=2, keepdims=True) + EPS)


if __name__ == "__main__":
    # Small shapes consistent with the module.
    B, L_e, L_d = 2, 8, 8
    n_encoder, n_decoder, n_att = 16, 16, 32

    key = jax.random.PRNGKey(0)
    k = jax.random.split(key, 8)

    # Deterministic parameter init (PyTorch Linear-style uniform bounds).
    def uinit(kk, shape, fan_in):
        bound = 1.0 / jnp.sqrt(fan_in)
        return jax.random.uniform(kk, shape, jnp.float32, -bound, bound)

    w_en = uinit(k[0], (n_att, n_encoder), n_encoder)
    b_en = uinit(k[1], (n_att,), n_encoder)
    w_de = uinit(k[2], (n_att, n_decoder), n_decoder)
    w_att = uinit(k[3], (1, n_att), n_att)
    b_att = uinit(k[4], (1,), n_att)
    params = (w_en, b_en, w_de, w_att, b_att)

    h_e = jax.random.normal(k[5], (B, L_e, n_encoder), jnp.float32)
    h_d = jax.random.normal(k[6], (B, L_d, n_decoder), jnp.float32)
    # Mask: first batch keeps 6 encoder positions, second keeps all 8.
    lengths = jnp.array([6, 8], jnp.int32)
    mask = (jnp.arange(L_e)[None, :] < lengths[:, None]).astype(jnp.float32)

    out = attention_pallas(h_e, h_d, mask, params)
    out = jax.block_until_ready(out)

    ref = attention_reference(h_e, h_d, mask, params)
    assert out.shape == (B, L_d, L_e)
    assert jnp.allclose(out, ref, atol=1e-5, rtol=1e-5), "mismatch vs reference"

    print("KERNEL_OK")
</pallas_src>

<mosaic_0001>
module attributes {stable_mosaic.version = 11 : i64} {
  func.func @_attention_kernel(%arg0: i32, %arg1: i32, %arg2: memref<32xf32, #tpu.memory_space<smem>>, %arg3: memref<1xf32, #tpu.memory_space<smem>>, %arg4: memref<1x32x8xf32, #tpu.memory_space<vmem>>, %arg5: memref<1x8x32xf32, #tpu.memory_space<vmem>>, %arg6: memref<1x1x8xf32, #tpu.memory_space<vmem>>, %arg7: memref<1x8x8xf32, #tpu.memory_space<vmem>>, %arg8: memref<8x8xf32, #tpu.memory_space<vmem>>) attributes {dimension_semantics = [#tpu.dimension_semantics<parallel>, #tpu.dimension_semantics<parallel>], iteration_bounds = array<i64: 2, 1>, scalar_prefetch = 0 : i64, scratch_operands = 1 : i64, tpu.core_type = #tpu.core_type<tc>, window_params = [{transform_indices = @transform_0, window_bounds = array<i64: 32>}, {transform_indices = @transform_1, window_bounds = array<i64: 1>}, {transform_indices = @transform_2, window_bounds = array<i64: 1, 32, 8>}, {transform_indices = @transform_3, window_bounds = array<i64: 1, 8, 32>}, {transform_indices = @transform_4, window_bounds = array<i64: 1, 1, 8>}, {transform_indices = @transform_5, window_bounds = array<i64: 1, 8, 8>}]} {
    %c0 = arith.constant 0 : index
    %0 = memref.load %arg3[%c0] : memref<1xf32, #tpu.memory_space<smem>>
    %c0_0 = arith.constant 0 : index
    %c0_1 = arith.constant 0 : index
    %c0_2 = arith.constant 0 : index
    %1 = vector.load %arg5[%c0_0, %c0_1, %c0_2] : memref<1x8x32xf32, #tpu.memory_space<vmem>>, vector<1x8x32xf32>
    %2 = vector.shape_cast %1 : vector<1x8x32xf32> to vector<8x32xf32>
    %c0_3 = arith.constant 0 : index
    %c0_4 = arith.constant 0 : index
    %c0_5 = arith.constant 0 : index
    %3 = vector.load %arg4[%c0_3, %c0_4, %c0_5] : memref<1x32x8xf32, #tpu.memory_space<vmem>>, vector<1x32x8xf32>
    %4 = vector.shape_cast %3 : vector<1x32x8xf32> to vector<32x8xf32>
    %5 = vector.broadcast %0 : f32 to vector<8x8xf32>
    %6 = vector.extract_strided_slice %2 {offsets = [0, 0], sizes = [8, 1], strides = [1, 1]} : vector<8x32xf32> to vector<8x1xf32>
    %7 = vector.extract_strided_slice %4 {offsets = [0, 0], sizes = [1, 8], strides = [1, 1]} : vector<32x8xf32> to vector<1x8xf32>
    %8 = vector.broadcast %6 : vector<8x1xf32> to vector<8x8xf32>
    %9 = vector.broadcast %7 : vector<1x8xf32> to vector<8x8xf32>
    %10 = arith.addf %8, %9 : vector<8x8xf32>
    %11 = math.tanh %10 : vector<8x8xf32>
    %c0_6 = arith.constant 0 : index
    %12 = memref.load %arg2[%c0_6] : memref<32xf32, #tpu.memory_space<smem>>
    %13 = vector.broadcast %12 : f32 to vector<8x8xf32>
    %14 = arith.mulf %13, %11 : vector<8x8xf32>
    %15 = arith.addf %5, %14 : vector<8x8xf32>
    %16 = vector.extract_strided_slice %2 {offsets = [0, 1], sizes = [8, 1], strides = [1, 1]} : vector<8x32xf32> to vector<8x1xf32>
    %17 = vector.extract_strided_slice %4 {offsets = [1, 0], sizes = [1, 8], strides = [1, 1]} : vector<32x8xf32> to vector<1x8xf32>
    %18 = vector.broadcast %16 : vector<8x1xf32> to vector<8x8xf32>
    %19 = vector.broadcast %17 : vector<1x8xf32> to vector<8x8xf32>
    %20 = arith.addf %18, %19 : vector<8x8xf32>
    %21 = math.tanh %20 : vector<8x8xf32>
    %c1 = arith.constant 1 : index
    %22 = memref.load %arg2[%c1] : memref<32xf32, #tpu.memory_space<smem>>
    %23 = vector.broadcast %22 : f32 to vector<8x8xf32>
    %24 = arith.mulf %23, %21 : vector<8x8xf32>
    %25 = arith.addf %15, %24 : vector<8x8xf32>
    %26 = vector.extract_strided_slice %2 {offsets = [0, 2], sizes = [8, 1], strides = [1, 1]} : vector<8x32xf32> to vector<8x1xf32>
    %27 = vector.extract_strided_slice %4 {offsets = [2, 0], sizes = [1, 8], strides = [1, 1]} : vector<32x8xf32> to vector<1x8xf32>
    %28 = vector.broadcast %26 : vector<8x1xf32> to vector<8x8xf32>
    %29 = vector.broadcast %27 : vector<1x8xf32> to vector<8x8xf32>
    %30 = arith.addf %28, %29 : vector<8x8xf32>
    %31 = math.tanh %30 : vector<8x8xf32>
    %c2 = arith.constant 2 : index
    %32 = memref.load %arg2[%c2] : memref<32xf32, #tpu.memory_space<smem>>
    %33 = vector.broadcast %32 : f32 to vector<8x8xf32>
    %34 = arith.mulf %33, %31 : vector<8x8xf32>
    %35 = arith.addf %25, %34 : vector<8x8xf32>
    %36 = vector.extract_strided_slice %2 {offsets = [0, 3], sizes = [8, 1], strides = [1, 1]} : vector<8x32xf32> to vector<8x1xf32>
    %37 = vector.extract_strided_slice %4 {offsets = [3, 0], sizes = [1, 8], strides = [1, 1]} : vector<32x8xf32> to vector<1x8xf32>
    %38 = vector.broadcast %36 : vector<8x1xf32> to vector<8x8xf32>
    %39 = vector.broadcast %37 : vector<1x8xf32> to vector<8x8xf32>
    %40 = arith.addf %38, %39 : vector<8x8xf32>
    %41 = math.tanh %40 : vector<8x8xf32>
    %c3 = arith.constant 3 : index
    %42 = memref.load %arg2[%c3] : memref<32xf32, #tpu.memory_space<smem>>
    %43 = vector.broadcast %42 : f32 to vector<8x8xf32>
    %44 = arith.mulf %43, %41 : vector<8x8xf32>
    %45 = arith.addf %35, %44 : vector<8x8xf32>
    %46 = vector.extract_strided_slice %2 {offsets = [0, 4], sizes = [8, 1], strides = [1, 1]} : vector<8x32xf32> to vector<8x1xf32>
    %47 = vector.extract_strided_slice %4 {offsets = [4, 0], sizes = [1, 8], strides = [1, 1]} : vector<32x8xf32> to vector<1x8xf32>
    %48 = vector.broadcast %46 : vector<8x1xf32> to vector<8x8xf32>
    %49 = vector.broadcast %47 : vector<1x8xf32> to vector<8x8xf32>
    %50 = arith.addf %48, %49 : vector<8x8xf32>
    %51 = math.tanh %50 : vector<8x8xf32>
    %c4 = arith.constant 4 : index
    %52 = memref.load %arg2[%c4] : memref<32xf32, #tpu.memory_space<smem>>
    %53 = vector.broadcast %52 : f32 to vector<8x8xf32>
    %54 = arith.mulf %53, %51 : vector<8x8xf32>
    %55 = arith.addf %45, %54 : vector<8x8xf32>
    %56 = vector.extract_strided_slice %2 {offsets = [0, 5], sizes = [8, 1], strides = [1, 1]} : vector<8x32xf32> to vector<8x1xf32>
    %57 = vector.extract_strided_slice %4 {offsets = [5, 0], sizes = [1, 8], strides = [1, 1]} : vector<32x8xf32> to vector<1x8xf32>
    %58 = vector.broadcast %56 : vector<8x1xf32> to vector<8x8xf32>
    %59 = vector.broadcast %57 : vector<1x8xf32> to vector<8x8xf32>
    %60 = arith.addf %58, %59 : vector<8x8xf32>
    %61 = math.tanh %60 : vector<8x8xf32>
    %c5 = arith.constant 5 : index
    %62 = memref.load %arg2[%c5] : memref<32xf32, #tpu.memory_space<smem>>
    %63 = vector.broadcast %62 : f32 to vector<8x8xf32>
    %64 = arith.mulf %63, %61 : vector<8x8xf32>
    %65 = arith.addf %55, %64 : vector<8x8xf32>
    %66 = vector.extract_strided_slice %2 {offsets = [0, 6], sizes = [8, 1], strides = [1, 1]} : vector<8x32xf32> to vector<8x1xf32>
    %67 = vector.extract_strided_slice %4 {offsets = [6, 0], sizes = [1, 8], strides = [1, 1]} : vector<32x8xf32> to vector<1x8xf32>
    %68 = vector.broadcast %66 : vector<8x1xf32> to vector<8x8xf32>
    %69 = vector.broadcast %67 : vector<1x8xf32> to vector<8x8xf32>
    %70 = arith.addf %68, %69 : vector<8x8xf32>
    %71 = math.tanh %70 : vector<8x8xf32>
    %c6 = arith.constant 6 : index
    %72 = memref.load %arg2[%c6] : memref<32xf32, #tpu.memory_space<smem>>
    %73 = vector.broadcast %72 : f32 to vector<8x8xf32>
    %74 = arith.mulf %73, %71 : vector<8x8xf32>
    %75 = arith.addf %65, %74 : vector<8x8xf32>
    %76 = vector.extract_strided_slice %2 {offsets = [0, 7], sizes = [8, 1], strides = [1, 1]} : vector<8x32xf32> to vector<8x1xf32>
    %77 = vector.extract_strided_slice %4 {offsets = [7, 0], sizes = [1, 8], strides = [1, 1]} : vector<32x8xf32> to vector<1x8xf32>
    %78 = vector.broadcast %76 : vector<8x1xf32> to vector<8x8xf32>
    %79 = vector.broadcast %77 : vector<1x8xf32> to vector<8x8xf32>
    %80 = arith.addf %78, %79 : vector<8x8xf32>
    %81 = math.tanh %80 : vector<8x8xf32>
    %c7 = arith.constant 7 : index
    %82 = memref.load %arg2[%c7] : memref<32xf32, #tpu.memory_space<smem>>
    %83 = vector.broadcast %82 : f32 to vector<8x8xf32>
    %84 = arith.mulf %83, %81 : vector<8x8xf32>
    %85 = arith.addf %75, %84 : vector<8x8xf32>
    %86 = vector.extract_strided_slice %2 {offsets = [0, 8], sizes = [8, 1], strides = [1, 1]} : vector<8x32xf32> to vector<8x1xf32>
    %87 = vector.extract_strided_slice %4 {offsets = [8, 0], sizes = [1, 8], strides = [1, 1]} : vector<32x8xf32> to vector<1x8xf32>
    %88 = vector.broadcast %86 : vector<8x1xf32> to vector<8x8xf32>
    %89 = vector.broadcast %87 : vector<1x8xf32> to vector<8x8xf32>
    %90 = arith.addf %88, %89 : vector<8x8xf32>
    %91 = math.tanh %90 : vector<8x8xf32>
    %c8 = arith.constant 8 : index
    %92 = memref.load %arg2[%c8] : memref<32xf32, #tpu.memory_space<smem>>
    %93 = vector.broadcast %92 : f32 to vector<8x8xf32>
    %94 = arith.mulf %93, %91 : vector<8x8xf32>
    %95 = arith.addf %85, %94 : vector<8x8xf32>
    %96 = vector.extract_strided_slice %2 {offsets = [0, 9], sizes = [8, 1], strides = [1, 1]} : vector<8x32xf32> to vector<8x1xf32>
    %97 = vector.extract_strided_slice %4 {offsets = [9, 0], sizes = [1, 8], strides = [1, 1]} : vector<32x8xf32> to vector<1x8xf32>
    %98 = vector.broadcast %96 : vector<8x1xf32> to vector<8x8xf32>
    %99 = vector.broadcast %97 : vector<1x8xf32> to vector<8x8xf32>
    %100 = arith.addf %98, %99 : vector<8x8xf32>
    %101 = math.tanh %100 : vector<8x8xf32>
    %c9 = arith.constant 9 : index
    %102 = memref.load %arg2[%c9] : memref<32xf32, #tpu.memory_space<smem>>
    %103 = vector.broadcast %102 : f32 to vector<8x8xf32>
    %104 = arith.mulf %103, %101 : vector<8x8xf32>
    %105 = arith.addf %95, %104 : vector<8x8xf32>
    %106 = vector.extract_strided_slice %2 {offsets = [0, 10], sizes = [8, 1], strides = [1, 1]} : vector<8x32xf32> to vector<8x1xf32>
    %107 = vector.extract_strided_slice %4 {offsets = [10, 0], sizes = [1, 8], strides = [1, 1]} : vector<32x8xf32> to vector<1x8xf32>
    %108 = vector.broadcast %106 : vector<8x1xf32> to vector<8x8xf32>
    %109 = vector.broadcast %107 : vector<1x8xf32> to vector<8x8xf32>
    %110 = arith.addf %108, %109 : vector<8x8xf32>
    %111 = math.tanh %110 : vector<8x8xf32>
    %c10 = arith.constant 10 : index
    %112 = memref.load %arg2[%c10] : memref<32xf32, #tpu.memory_space<smem>>
    %113 = vector.broadcast %112 : f32 to vector<8x8xf32>
    %114 = arith.mulf %113, %111 : vector<8x8xf32>
    %115 = arith.addf %105, %114 : vector<8x8xf32>
    %116 = vector.extract_strided_slice %2 {offsets = [0, 11], sizes = [8, 1], strides = [1, 1]} : vector<8x32xf32> to vector<8x1xf32>
    %117 = vector.extract_strided_slice %4 {offsets = [11, 0], sizes = [1, 8], strides = [1, 1]} : vector<32x8xf32> to vector<1x8xf32>
    %118 = vector.broadcast %116 : vector<8x1xf32> to vector<8x8xf32>
    %119 = vector.broadcast %117 : vector<1x8xf32> to vector<8x8xf32>
    %120 = arith.addf %118, %119 : vector<8x8xf32>
    %121 = math.tanh %120 : vector<8x8xf32>
    %c11 = arith.constant 11 : index
    %122 = memref.load %arg2[%c11] : memref<32xf32, #tpu.memory_space<smem>>
    %123 = vector.broadcast %122 : f32 to vector<8x8xf32>
    %124 = arith.mulf %123, %121 : vector<8x8xf32>
    %125 = arith.addf %115, %124 : vector<8x8xf32>
    %126 = vector.extract_strided_slice %2 {offsets = [0, 12], sizes = [8, 1], strides = [1, 1]} : vector<8x32xf32> to vector<8x1xf32>
    %127 = vector.extract_strided_slice %4 {offsets = [12, 0], sizes = [1, 8], strides = [1, 1]} : vector<32x8xf32> to vector<1x8xf32>
    %128 = vector.broadcast %126 : vector<8x1xf32> to vector<8x8xf32>
    %129 = vector.broadcast %127 : vector<1x8xf32> to vector<8x8xf32>
    %130 = arith.addf %128, %129 : vector<8x8xf32>
    %131 = math.tanh %130 : vector<8x8xf32>
    %c12 = arith.constant 12 : index
    %132 = memref.load %arg2[%c12] : memref<32xf32, #tpu.memory_space<smem>>
    %133 = vector.broadcast %132 : f32 to vector<8x8xf32>
    %134 = arith.mulf %133, %131 : vector<8x8xf32>
    %135 = arith.addf %125, %134 : vector<8x8xf32>
    %136 = vector.extract_strided_slice %2 {offsets = [0, 13], sizes = [8, 1], strides = [1, 1]} : vector<8x32xf32> to vector<8x1xf32>
    %137 = vector.extract_strided_slice %4 {offsets = [13, 0], sizes = [1, 8], strides = [1, 1]} : vector<32x8xf32> to vector<1x8xf32>
    %138 = vector.broadcast %136 : vector<8x1xf32> to vector<8x8xf32>
    %139 = vector.broadcast %137 : vector<1x8xf32> to vector<8x8xf32>
    %140 = arith.addf %138, %139 : vector<8x8xf32>
    %141 = math.tanh %140 : vector<8x8xf32>
    %c13 = arith.constant 13 : index
    %142 = memref.load %arg2[%c13] : memref<32xf32, #tpu.memory_space<smem>>
    %143 = vector.broadcast %142 : f32 to vector<8x8xf32>
    %144 = arith.mulf %143, %141 : vector<8x8xf32>
    %145 = arith.addf %135, %144 : vector<8x8xf32>
    %146 = vector.extract_strided_slice %2 {offsets = [0, 14], sizes = [8, 1], strides = [1, 1]} : vector<8x32xf32> to vector<8x1xf32>
    %147 = vector.extract_strided_slice %4 {offsets = [14, 0], sizes = [1, 8], strides = [1, 1]} : vector<32x8xf32> to vector<1x8xf32>
    %148 = vector.broadcast %146 : vector<8x1xf32> to vector<8x8xf32>
    %149 = vector.broadcast %147 : vector<1x8xf32> to vector<8x8xf32>
    %150 = arith.addf %148, %149 : vector<8x8xf32>
    %151 = math.tanh %150 : vector<8x8xf32>
    %c14 = arith.constant 14 : index
    %152 = memref.load %arg2[%c14] : memref<32xf32, #tpu.memory_space<smem>>
    %153 = vector.broadcast %152 : f32 to vector<8x8xf32>
    %154 = arith.mulf %153, %151 : vector<8x8xf32>
    %155 = arith.addf %145, %154 : vector<8x8xf32>
    %156 = vector.extract_strided_slice %2 {offsets = [0, 15], sizes = [8, 1], strides = [1, 1]} : vector<8x32xf32> to vector<8x1xf32>
    %157 = vector.extract_strided_slice %4 {offsets = [15, 0], sizes = [1, 8], strides = [1, 1]} : vector<32x8xf32> to vector<1x8xf32>
    %158 = vector.broadcast %156 : vector<8x1xf32> to vector<8x8xf32>
    %159 = vector.broadcast %157 : vector<1x8xf32> to vector<8x8xf32>
    %160 = arith.addf %158, %159 : vector<8x8xf32>
    %161 = math.tanh %160 : vector<8x8xf32>
    %c15 = arith.constant 15 : index
    %162 = memref.load %arg2[%c15] : memref<32xf32, #tpu.memory_space<smem>>
    %163 = vector.broadcast %162 : f32 to vector<8x8xf32>
    %164 = arith.mulf %163, %161 : vector<8x8xf32>
    %165 = arith.addf %155, %164 : vector<8x8xf32>
    %166 = vector.extract_strided_slice %2 {offsets = [0, 16], sizes = [8, 1], strides = [1, 1]} : vector<8x32xf32> to vector<8x1xf32>
    %167 = vector.extract_strided_slice %4 {offsets = [16, 0], sizes = [1, 8], strides = [1, 1]} : vector<32x8xf32> to vector<1x8xf32>
    %168 = vector.broadcast %166 : vector<8x1xf32> to vector<8x8xf32>
    %169 = vector.broadcast %167 : vector<1x8xf32> to vector<8x8xf32>
    %170 = arith.addf %168, %169 : vector<8x8xf32>
    %171 = math.tanh %170 : vector<8x8xf32>
    %c16 = arith.constant 16 : index
    %172 = memref.load %arg2[%c16] : memref<32xf32, #tpu.memory_space<smem>>
    %173 = vector.broadcast %172 : f32 to vector<8x8xf32>
    %174 = arith.mulf %173, %171 : vector<8x8xf32>
    %175 = arith.addf %165, %174 : vector<8x8xf32>
    %176 = vector.extract_strided_slice %2 {offsets = [0, 17], sizes = [8, 1], strides = [1, 1]} : vector<8x32xf32> to vector<8x1xf32>
    %177 = vector.extract_strided_slice %4 {offsets = [17, 0], sizes = [1, 8], strides = [1, 1]} : vector<32x8xf32> to vector<1x8xf32>
    %178 = vector.broadcast %176 : vector<8x1xf32> to vector<8x8xf32>
    %179 = vector.broadcast %177 : vector<1x8xf32> to vector<8x8xf32>
    %180 = arith.addf %178, %179 : vector<8x8xf32>
    %181 = math.tanh %180 : vector<8x8xf32>
    %c17 = arith.constant 17 : index
    %182 = memref.load %arg2[%c17] : memref<32xf32, #tpu.memory_space<smem>>
    %183 = vector.broadcast %182 : f32 to vector<8x8xf32>
    %184 = arith.mulf %183, %181 : vector<8x8xf32>
    %185 = arith.addf %175, %184 : vector<8x8xf32>
    %186 = vector.extract_strided_slice %2 {offsets = [0, 18], sizes = [8, 1], strides = [1, 1]} : vector<8x32xf32> to vector<8x1xf32>
    %187 = vector.extract_strided_slice %4 {offsets = [18, 0], sizes = [1, 8], strides = [1, 1]} : vector<32x8xf32> to vector<1x8xf32>
    %188 = vector.broadcast %186 : vector<8x1xf32> to vector<8x8xf32>
    %189 = vector.broadcast %187 : vector<1x8xf32> to vector<8x8xf32>
    %190 = arith.addf %188, %189 : vector<8x8xf32>
    %191 = math.tanh %190 : vector<8x8xf32>
    %c18 = arith.constant 18 : index
    %192 = memref.load %arg2[%c18] : memref<32xf32, #tpu.memory_space<smem>>
    %193 = vector.broadcast %192 : f32 to vector<8x8xf32>
    %194 = arith.mulf %193, %191 : vector<8x8xf32>
    %195 = arith.addf %185, %194 : vector<8x8xf32>
    %196 = vector.extract_strided_slice %2 {offsets = [0, 19], sizes = [8, 1], strides = [1, 1]} : vector<8x32xf32> to vector<8x1xf32>
    %197 = vector.extract_strided_slice %4 {offsets = [19, 0], sizes = [1, 8], strides = [1, 1]} : vector<32x8xf32> to vector<1x8xf32>
    %198 = vector.broadcast %196 : vector<8x1xf32> to vector<8x8xf32>
    %199 = vector.broadcast %197 : vector<1x8xf32> to vector<8x8xf32>
    %200 = arith.addf %198, %199 : vector<8x8xf32>
    %201 = math.tanh %200 : vector<8x8xf32>
    %c19 = arith.constant 19 : index
    %202 = memref.load %arg2[%c19] : memref<32xf32, #tpu.memory_space<smem>>
    %203 = vector.broadcast %202 : f32 to vector<8x8xf32>
    %204 = arith.mulf %203, %201 : vector<8x8xf32>
    %205 = arith.addf %195, %204 : vector<8x8xf32>
    %206 = vector.extract_strided_slice %2 {offsets = [0, 20], sizes = [8, 1], strides = [1, 1]} : vector<8x32xf32> to vector<8x1xf32>
    %207 = vector.extract_strided_slice %4 {offsets = [20, 0], sizes = [1, 8], strides = [1, 1]} : vector<32x8xf32> to vector<1x8xf32>
    %208 = vector.broadcast %206 : vector<8x1xf32> to vector<8x8xf32>
    %209 = vector.broadcast %207 : vector<1x8xf32> to vector<8x8xf32>
    %210 = arith.addf %208, %209 : vector<8x8xf32>
    %211 = math.tanh %210 : vector<8x8xf32>
    %c20 = arith.constant 20 : index
    %212 = memref.load %arg2[%c20] : memref<32xf32, #tpu.memory_space<smem>>
    %213 = vector.broadcast %212 : f32 to vector<8x8xf32>
    %214 = arith.mulf %213, %211 : vector<8x8xf32>
    %215 = arith.addf %205, %214 : vector<8x8xf32>
    %216 = vector.extract_strided_slice %2 {offsets = [0, 21], sizes = [8, 1], strides = [1, 1]} : vector<8x32xf32> to vector<8x1xf32>
    %217 = vector.extract_strided_slice %4 {offsets = [21, 0], sizes = [1, 8], strides = [1, 1]} : vector<32x8xf32> to vector<1x8xf32>
    %218 = vector.broadcast %216 : vector<8x1xf32> to vector<8x8xf32>
    %219 = vector.broadcast %217 : vector<1x8xf32> to vector<8x8xf32>
    %220 = arith.addf %218, %219 : vector<8x8xf32>
    %221 = math.tanh %220 : vector<8x8xf32>
    %c21 = arith.constant 21 : index
    %222 = memref.load %arg2[%c21] : memref<32xf32, #tpu.memory_space<smem>>
    %223 = vector.broadcast %222 : f32 to vector<8x8xf32>
    %224 = arith.mulf %223, %221 : vector<8x8xf32>
    %225 = arith.addf %215, %224 : vector<8x8xf32>
    %226 = vector.extract_strided_slice %2 {offsets = [0, 22], sizes = [8, 1], strides = [1, 1]} : vector<8x32xf32> to vector<8x1xf32>
    %227 = vector.extract_strided_slice %4 {offsets = [22, 0], sizes = [1, 8], strides = [1, 1]} : vector<32x8xf32> to vector<1x8xf32>
    %228 = vector.broadcast %226 : vector<8x1xf32> to vector<8x8xf32>
    %229 = vector.broadcast %227 : vector<1x8xf32> to vector<8x8xf32>
    %230 = arith.addf %228, %229 : vector<8x8xf32>
    %231 = math.tanh %230 : vector<8x8xf32>
    %c22 = arith.constant 22 : index
    %232 = memref.load %arg2[%c22] : memref<32xf32, #tpu.memory_space<smem>>
    %233 = vector.broadcast %232 : f32 to vector<8x8xf32>
    %234 = arith.mulf %233, %231 : vector<8x8xf32>
    %235 = arith.addf %225, %234 : vector<8x8xf32>
    %236 = vector.extract_strided_slice %2 {offsets = [0, 23], sizes = [8, 1], strides = [1, 1]} : vector<8x32xf32> to vector<8x1xf32>
    %237 = vector.extract_strided_slice %4 {offsets = [23, 0], sizes = [1, 8], strides = [1, 1]} : vector<32x8xf32> to vector<1x8xf32>
    %238 = vector.broadcast %236 : vector<8x1xf32> to vector<8x8xf32>
    %239 = vector.broadcast %237 : vector<1x8xf32> to vector<8x8xf32>
    %240 = arith.addf %238, %239 : vector<8x8xf32>
    %241 = math.tanh %240 : vector<8x8xf32>
    %c23 = arith.constant 23 : index
    %242 = memref.load %arg2[%c23] : memref<32xf32, #tpu.memory_space<smem>>
    %243 = vector.broadcast %242 : f32 to vector<8x8xf32>
    %244 = arith.mulf %243, %241 : vector<8x8xf32>
    %245 = arith.addf %235, %244 : vector<8x8xf32>
    %246 = vector.extract_strided_slice %2 {offsets = [0, 24], sizes = [8, 1], strides = [1, 1]} : vector<8x32xf32> to vector<8x1xf32>
    %247 = vector.extract_strided_slice %4 {offsets = [24, 0], sizes = [1, 8], strides = [1, 1]} : vector<32x8xf32> to vector<1x8xf32>
    %248 = vector.broadcast %246 : vector<8x1xf32> to vector<8x8xf32>
    %249 = vector.broadcast %247 : vector<1x8xf32> to vector<8x8xf32>
    %250 = arith.addf %248, %249 : vector<8x8xf32>
    %251 = math.tanh %250 : vector<8x8xf32>
    %c24 = arith.constant 24 : index
    %252 = memref.load %arg2[%c24] : memref<32xf32, #tpu.memory_space<smem>>
    %253 = vector.broadcast %252 : f32 to vector<8x8xf32>
    %254 = arith.mulf %253, %251 : vector<8x8xf32>
    %255 = arith.addf %245, %254 : vector<8x8xf32>
    %256 = vector.extract_strided_slice %2 {offsets = [0, 25], sizes = [8, 1], strides = [1, 1]} : vector<8x32xf32> to vector<8x1xf32>
    %257 = vector.extract_strided_slice %4 {offsets = [25, 0], sizes = [1, 8], strides = [1, 1]} : vector<32x8xf32> to vector<1x8xf32>
    %258 = vector.broadcast %256 : vector<8x1xf32> to vector<8x8xf32>
    %259 = vector.broadcast %257 : vector<1x8xf32> to vector<8x8xf32>
    %260 = arith.addf %258, %259 : vector<8x8xf32>
    %261 = math.tanh %260 : vector<8x8xf32>
    %c25 = arith.constant 25 : index
    %262 = memref.load %arg2[%c25] : memref<32xf32, #tpu.memory_space<smem>>
    %263 = vector.broadcast %262 : f32 to vector<8x8xf32>
    %264 = arith.mulf %263, %261 : vector<8x8xf32>
    %265 = arith.addf %255, %264 : vector<8x8xf32>
    %266 = vector.extract_strided_slice %2 {offsets = [0, 26], sizes = [8, 1], strides = [1, 1]} : vector<8x32xf32> to vector<8x1xf32>
    %267 = vector.extract_strided_slice %4 {offsets = [26, 0], sizes = [1, 8], strides = [1, 1]} : vector<32x8xf32> to vector<1x8xf32>
    %268 = vector.broadcast %266 : vector<8x1xf32> to vector<8x8xf32>
    %269 = vector.broadcast %267 : vector<1x8xf32> to vector<8x8xf32>
    %270 = arith.addf %268, %269 : vector<8x8xf32>
    %271 = math.tanh %270 : vector<8x8xf32>
    %c26 = arith.constant 26 : index
    %272 = memref.load %arg2[%c26] : memref<32xf32, #tpu.memory_space<smem>>
    %273 = vector.broadcast %272 : f32 to vector<8x8xf32>
    %274 = arith.mulf %273, %271 : vector<8x8xf32>
    %275 = arith.addf %265, %274 : vector<8x8xf32>
    %276 = vector.extract_strided_slice %2 {offsets = [0, 27], sizes = [8, 1], strides = [1, 1]} : vector<8x32xf32> to vector<8x1xf32>
    %277 = vector.extract_strided_slice %4 {offsets = [27, 0], sizes = [1, 8], strides = [1, 1]} : vector<32x8xf32> to vector<1x8xf32>
    %278 = vector.broadcast %276 : vector<8x1xf32> to vector<8x8xf32>
    %279 = vector.broadcast %277 : vector<1x8xf32> to vector<8x8xf32>
    %280 = arith.addf %278, %279 : vector<8x8xf32>
    %281 = math.tanh %280 : vector<8x8xf32>
    %c27 = arith.constant 27 : index
    %282 = memref.load %arg2[%c27] : memref<32xf32, #tpu.memory_space<smem>>
    %283 = vector.broadcast %282 : f32 to vector<8x8xf32>
    %284 = arith.mulf %283, %281 : vector<8x8xf32>
    %285 = arith.addf %275, %284 : vector<8x8xf32>
    %286 = vector.extract_strided_slice %2 {offsets = [0, 28], sizes = [8, 1], strides = [1, 1]} : vector<8x32xf32> to vector<8x1xf32>
    %287 = vector.extract_strided_slice %4 {offsets = [28, 0], sizes = [1, 8], strides = [1, 1]} : vector<32x8xf32> to vector<1x8xf32>
    %288 = vector.broadcast %286 : vector<8x1xf32> to vector<8x8xf32>
    %289 = vector.broadcast %287 : vector<1x8xf32> to vector<8x8xf32>
    %290 = arith.addf %288, %289 : vector<8x8xf32>
    %291 = math.tanh %290 : vector<8x8xf32>
    %c28 = arith.constant 28 : index
    %292 = memref.load %arg2[%c28] : memref<32xf32, #tpu.memory_space<smem>>
    %293 = vector.broadcast %292 : f32 to vector<8x8xf32>
    %294 = arith.mulf %293, %291 : vector<8x8xf32>
    %295 = arith.addf %285, %294 : vector<8x8xf32>
    %296 = vector.extract_strided_slice %2 {offsets = [0, 29], sizes = [8, 1], strides = [1, 1]} : vector<8x32xf32> to vector<8x1xf32>
    %297 = vector.extract_strided_slice %4 {offsets = [29, 0], sizes = [1, 8], strides = [1, 1]} : vector<32x8xf32> to vector<1x8xf32>
    %298 = vector.broadcast %296 : vector<8x1xf32> to vector<8x8xf32>
    %299 = vector.broadcast %297 : vector<1x8xf32> to vector<8x8xf32>
    %300 = arith.addf %298, %299 : vector<8x8xf32>
    %301 = math.tanh %300 : vector<8x8xf32>
    %c29 = arith.constant 29 : index
    %302 = memref.load %arg2[%c29] : memref<32xf32, #tpu.memory_space<smem>>
    %303 = vector.broadcast %302 : f32 to vector<8x8xf32>
    %304 = arith.mulf %303, %301 : vector<8x8xf32>
    %305 = arith.addf %295, %304 : vector<8x8xf32>
    %306 = vector.extract_strided_slice %2 {offsets = [0, 30], sizes = [8, 1], strides = [1, 1]} : vector<8x32xf32> to vector<8x1xf32>
    %307 = vector.extract_strided_slice %4 {offsets = [30, 0], sizes = [1, 8], strides = [1, 1]} : vector<32x8xf32> to vector<1x8xf32>
    %308 = vector.broadcast %306 : vector<8x1xf32> to vector<8x8xf32>
    %309 = vector.broadcast %307 : vector<1x8xf32> to vector<8x8xf32>
    %310 = arith.addf %308, %309 : vector<8x8xf32>
    %311 = math.tanh %310 : vector<8x8xf32>
    %c30 = arith.constant 30 : index
    %312 = memref.load %arg2[%c30] : memref<32xf32, #tpu.memory_space<smem>>
    %313 = vector.broadcast %312 : f32 to vector<8x8xf32>
    %314 = arith.mulf %313, %311 : vector<8x8xf32>
    %315 = arith.addf %305, %314 : vector<8x8xf32>
    %316 = vector.extract_strided_slice %2 {offsets = [0, 31], sizes = [8, 1], strides = [1, 1]} : vector<8x32xf32> to vector<8x1xf32>
    %317 = vector.extract_strided_slice %4 {offsets = [31, 0], sizes = [1, 8], strides = [1, 1]} : vector<32x8xf32> to vector<1x8xf32>
    %318 = vector.broadcast %316 : vector<8x1xf32> to vector<8x8xf32>
    %319 = vector.broadcast %317 : vector<1x8xf32> to vector<8x8xf32>
    %320 = arith.addf %318, %319 : vector<8x8xf32>
    %321 = math.tanh %320 : vector<8x8xf32>
    %c31 = arith.constant 31 : index
    %322 = memref.load %arg2[%c31] : memref<32xf32, #tpu.memory_space<smem>>
    %323 = vector.broadcast %322 : f32 to vector<8x8xf32>
    %324 = arith.mulf %323, %321 : vector<8x8xf32>
    %325 = arith.addf %315, %324 : vector<8x8xf32>
    %cst = arith.constant dense<0xFF800000> : vector<8xf32>
    %326 = vector.multi_reduction <maximumf>, %325, %cst [1] : vector<8x8xf32> to vector<8xf32>
    %327 = vector.shape_cast %326 : vector<8xf32> to vector<8x1xf32>
    %328 = vector.broadcast %327 : vector<8x1xf32> to vector<8x8xf32>
    %329 = arith.subf %325, %328 : vector<8x8xf32>
    %330 = math.exp %329 : vector<8x8xf32>
    %cst_7 = arith.constant dense<0.000000e+00> : vector<8xf32>
    %331 = vector.multi_reduction <add>, %330, %cst_7 [1] : vector<8x8xf32> to vector<8xf32>
    %332 = vector.shape_cast %331 : vector<8xf32> to vector<8x1xf32>
    %c0_8 = arith.constant 0 : index
    %c0_9 = arith.constant 0 : index
    %c0_10 = arith.constant 0 : index
    %333 = vector.load %arg6[%c0_8, %c0_9, %c0_10] : memref<1x1x8xf32, #tpu.memory_space<vmem>>, vector<1x1x8xf32>
    %334 = vector.shape_cast %333 : vector<1x1x8xf32> to vector<1x8xf32>
    %335 = vector.broadcast %334 : vector<1x8xf32> to vector<8x8xf32>
    %336 = arith.mulf %330, %335 : vector<8x8xf32>
    %cst_11 = arith.constant dense<0.000000e+00> : vector<8xf32>
    %337 = vector.multi_reduction <add>, %336, %cst_11 [1] : vector<8x8xf32> to vector<8xf32>
    %338 = vector.shape_cast %337 : vector<8xf32> to vector<8x1xf32>
    %cst_12 = arith.constant 9.99999993E-9 : f32
    %339 = vector.broadcast %cst_12 : f32 to vector<8x1xf32>
    %340 = arith.mulf %339, %332 : vector<8x1xf32>
    %341 = arith.addf %338, %340 : vector<8x1xf32>
    %cst_13 = arith.constant 1.000000e+00 : f32
    %342 = vector.broadcast %cst_13 : f32 to vector<8x1xf32>
    %343 = arith.divf %342, %341 : vector<8x1xf32>
    %344 = vector.broadcast %343 : vector<8x1xf32> to vector<8x8xf32>
    %345 = arith.mulf %336, %344 : vector<8x8xf32>
    %c0_14 = arith.constant 0 : index
    %c0_15 = arith.constant 0 : index
    %c0_16 = arith.constant 0 : index
    %346 = vector.load %arg7[%c0_14, %c0_15, %c0_16] : memref<1x8x8xf32, #tpu.memory_space<vmem>>, vector<1x8x8xf32>
    %347 = vector.shape_cast %346 : vector<1x8x8xf32> to vector<8x8xf32>
    %348 = vector.shape_cast %345 : vector<8x8xf32> to vector<1x8x8xf32>
    tpu.vector_store %arg7[%c0_14, %c0_15, %c0_16], %348 {strides = array<i32>} : memref<1x8x8xf32, #tpu.memory_space<vmem>>, vector<1x8x8xf32>,
    return
  }
  func.func @transform_0(%arg0: i32, %arg1: i32) -> i32 {
    %c0_i32 = arith.constant 0 : i32
    %c0_i32_0 = arith.constant 0 : i32
    return %c0_i32 : i32
  }
  func.func @transform_1(%arg0: i32, %arg1: i32) -> i32 {
    %c0_i32 = arith.constant 0 : i32
    %c0_i32_0 = arith.constant 0 : i32
    return %c0_i32 : i32
  }
  func.func @transform_2(%arg0: i32, %arg1: i32) -> (i32, i32, i32) {
    %c0_i32 = arith.constant 0 : i32
    %c0_i32_0 = arith.constant 0 : i32
    %c0_i32_1 = arith.constant 0 : i32
    return %arg0, %c0_i32, %c0_i32_0 : i32, i32, i32
  }
  func.func @transform_3(%arg0: i32, %arg1: i32) -> (i32, i32, i32) {
    %c0_i32 = arith.constant 0 : i32
    %c0_i32_0 = arith.constant 0 : i32
    return %arg0, %arg1, %c0_i32 : i32, i32, i32
  }
  func.func @transform_4(%arg0: i32, %arg1: i32) -> (i32, i32, i32) {
    %c0_i32 = arith.constant 0 : i32
    %c0_i32_0 = arith.constant 0 : i32
    %c0_i32_1 = arith.constant 0 : i32
    return %arg0, %c0_i32, %c0_i32_0 : i32, i32, i32
  }
  func.func @transform_5(%arg0: i32, %arg1: i32) -> (i32, i32, i32) {
    %c0_i32 = arith.constant 0 : i32
    %c0_i32_0 = arith.constant 0 : i32
    return %arg0, %arg1, %c0_i32 : i32, i32, i32
  }
}

</mosaic_0001>

<bundles_post_ra>
// kernel: tpu_custom_call.1
= control target key start
LH: loop header
LB: loop body
LE: loop exit
PB: predicated region body
PF: predicated region fallthrough
CT: control target
= control target key end

     0   :  { %s1639_s0 = inlined_call_operand.vmem [shape: f32[32], index: 0, kind: input, shape index: {}]   ;;  %s1640_s1 = inlined_call_operand.<no memory space> [shape: f32[1], index: 1, kind: input, shape index: {}]   ;;  %s1641_s2 = inlined_call_operand.vmem [shape: f32[2,32,8], index: 2, kind: input, shape index: {}]   ;;  %s1642_s3 = inlined_call_operand.vmem [shape: f32[2,8,32], index: 3, kind: input, shape index: {}]   ;;  %s1643_s4 = inlined_call_operand.vmem [shape: f32[2,1,8], index: 4, kind: input, shape index: {}]   ;;  %s1644_s5 = inlined_call_operand.hbm [shape: f32[2,8,8], index: 5, kind: output, shape index: {}]  }
   0x1   :  { %10 = sst [smem:[#allocation3]] %s1640_s1 }
   0x2   :  { %11 = vsyncpa [#allocation6], 0 }
   0x3   :  { %12 = vsyncpa [#allocation5], 0 }
   0x4   :  { %14 = vsyncpa [#allocation5 + $0x1], 0  ;;  %s1309_s20 = smov 0   ;;  %s1311_s21 = smov 0  }
   0x5   :  { %s1313_s22 = smov 0   ;;  %s1315_s23 = smov 0  }
   0x6   :  { %s1317_s24 = smov 0   ;;  %s1319_s25 = smov 0  }
   0x7 LB: > { %s896_s1 = sadd.s32 4294967295, %s1240_s25   ;;  %s897_s26 = sadd.s32 4294967294, %s1240_s25   ;;  %s1240_s25 = sphi %s1319_s25, %s20_s25   ;;  %s1236_s24 = sphi %s1317_s24, %s1653_s24   ;;  %s1232_s23 = sphi %s1315_s23, %s1652_s23   ;;  %s1228_s22 = sphi %s1313_s22, %s1651_s22   ;;  %s1224_s21 = sphi %s1311_s21, %s1650_s21   ;;  %s1220_s20 = sphi %s1309_s20, %s1649_s20  }
   0x8   : > { %s32_s27 = sadd.s32 1, %s1236_s24  ;;  %s163_s28 = sadd.s32 1, %s1228_s22 }
   0x9   : > { %p34_p0 = scmp.ge.s32.totalorder %s32_s27, 2  ;;  %p173_p1 = scmp.ne.s32.totalorder %s1228_s22, %s1224_s21 }
   0xa   : > { %p174_p2 = scmp.eq.s32.totalorder %s896_s1, 1  ;;  %p179_p3 = scmp.ne.s32.totalorder %s1224_s21, %s1220_s20 }
   0xb   : > { %s1655_s27 = smov (%p34_p0, %s32_s27), 0  ;;  %p180_p5 = scmp.eq.s32.totalorder %s897_s26, 1 }
   0xc   : > { %p1349_p4 = por %p174_p2, %p173_p1  ;;  %s158_s30 = ssub.s32 %s1236_s24, %s1655_s27 }
   0xd   : > { %p898_p6 = scmp.ge.s32.totalorder %s1240_s25, 1  ;;  %p161_p7 = scmp.eq.s32.totalorder %s158_s30, 0 }
   0xe   : > { %p1356_p8 = por %p180_p5, %p179_p3  ;;  %p187_p9 = scmp.lt.s32.totalorder %s1240_s25, 3 }
   0xf   : > { %s1362_s7 = scalar_select %p161_p7, %s1228_s22, %s163_s28  }
  0x10   : > { %p1364_p10 = pnand %p898_p6, %p187_p9  ;;  %p1368_p11 = scmp.eq.s32.totalorder %s896_s1, 0 }
  0x11   : > { %s200_s12 = sshll.u32 %s1639_s0, 4  ;;  %s201_s12 = int_to_ptr.vmem [resolvable:$true] %s200_s12 }
  0x12   : > { %p950_p12 = pneg %p1364_p10  ;;  %s1143_s13 = scalar_lea.vmem %s201_s12, 16 }
  0x13   : > { %p1144_p0 = scmp.ne.s32.totalorder %s201_s12, %s1143_s13  ;;  %p1151_p5 = scmp.lt.s32.totalorder %s201_s12, %s201_s12 }
  0x14   : > { %p951_p13 = pnand %p1368_p11, %p950_p12  ;;  %p1152_p6 = scmp.lt.s32.totalorder %s1143_s13, %s1143_s13 }
  0x16   : > { %p1145_p1 = pneg %p951_p13  ;;  %p1153_p7 = por %p1152_p6, %p1151_p5 }
  0x18   : > { %p1146_p2 = pnand %p1145_p1, %p1144_p0 }
  0x1a   : > { %p1147_p3 = pneg %p1146_p2 }
  0x1c   : > { %p1154_p9 = pnand %p1153_p7, %p1147_p3 }
  0x1e   : > { %1157 = shalt.err (!%p1154_p9)
}
  0x1f   : > { %s1242_s14 = smov [#allocation4]   ;;  %240 = sbr.rel (%p1364_p10) target bundleno = 625 (0x271), region = 40 }
  0x20   : > { %953 = dma.vmem_to_smem (!%p951_p13), %s201_s12, 16, %s1242_s14, [#allocation6]  }
  0x26   : > { %1211 = dma.done.wait (%p1368_p11), [#allocation6], 16  }
  0x27   : > { %1213 = vsyncadd (%p1368_p11), [#allocation6], 4294967280 }
  0x28   : > { %246 = sfence }
  0x29   : > { %p279_p12 = scmp.lt.s32.totalorder %s1232_s23, 1  ;;  %v1243_v0 = vmov 2   ;;  %v1244_v1 = vmov 0   ;;  %v1245_v3 = vmov 3   ;;  %v1246_v4 = vmov 1   ;;  %s1456_s8 = sld [smem:[#allocation4]] }
  0x2a   : > { %1044 = vset.pattern.permute.xlu1 %v1243_v0  ;;  %1042 = vset.pattern.permute.xlu0 %v1244_v1  ;;  %v1247_v5 = vmov 4   ;;  %v1248_v6 = vmov 5   ;;  %v1249_v7 = vmov 6   ;;  %v1250_v8 = vmov 8   ;;  %s1458_s9 = sld [smem:[#allocation3]]  ;;  %s1466_s10 = sld [smem:[#allocation4 + $0x1]] }
  0x2b   : > { %s1387_s15 = scalar_select %p279_p12, %s1232_s23, 1  ;;  %v1251_v9 = vmov 7   ;;  %v1252_v10 = vmov 11   ;;  %v1253_v11 = vmov 9   ;;  %v1254_v12 = vmov 14  }
  0x2c   : > { %v1255_v13 = vmov 10   ;;  %v1256_v14 = vmov 17   ;;  %v1257_v15 = vmov 12   ;;  %v1258_v16 = vmov 20   ;;  %s1468_s11 = sld [smem:[#allocation4 + $0x2]]  ;;  %s1476_s12 = sld [smem:[#allocation4 + $0x3]] }
  0x2d   : > { %s906_s16 = sshll.u32 %s1387_s15, 3  ;;  %v1259_v17 = vmov 13   ;;  %v1260_v18 = vmov 23   ;;  %v1261_v19 = vmov 15   ;;  %v1262_v20 = vmov 26   ;;  %s943_s1 = sshll.u32 %s1387_s15, 5 }
  0x2e   : > { %s290_s19 = scalar_lea.vmem %s1642_s3, %s906_s16  ;;  %v1263_v21 = vmov 16   ;;  %v1264_v22 = vmov 29   ;;  %v1265_v23 = vmov 18   ;;  %v1266_v24 = vmov 31   ;;  %s1431_s30 = scalar_lea.vmem %s1641_s2, %s943_s1 }
  0x2f   : > { %v1393_v2 = vld [vmem:[%s290_s19] sm:$0xff]  ;;  %v1267_v25 = vmov 19   ;;  %v1268_v26 = vmov 21   ;;  %v1269_v27 = vmov 22   ;;  %v1270_v28 = vmov 24   ;;  %v1471_v61 = vld [vmem:[%s1431_s30 + $0x8] sm:$0xff] }
  0x30   : > { %331 = vperm.xlu1 %1044, %v1393_v2   ;;  %303 = vperm.xlu0 %1042, %v1393_v2   ;;  %v1271_v29 = vmov 25   ;;  %v1272_v30 = vmov 27   ;;  %v1273_v31 = vmov 28   ;;  %v1274_v32 = vmov 30   ;;  %v1438_v37 = vld [vmem:[%s1431_s30] sm:$0xff]  ;;  %s1478_s13 = sld [smem:[#allocation4 + $0x4]] }
  0x31   : > { %v306_v33 = vlaneseq  ;;  %v313_v62 = vstv %s1456_s8  ;;  %s1485_s14 = sld [smem:[#allocation4 + $0x5]]  ;;  %s1491_s16 = sld [smem:[#allocation4 + $0x6]]  ;;  %vm750_vm0 = vcmask 64512  }
  0x32   : > { %s1498_s17 = sld [smem:[#allocation4 + $0x7]]  ;;  %s1502_s18 = sld [smem:[#allocation4 + $0x8]] }
  0x33   : > { %v307_v34 = vshrl.u32 %v306_v33, 7  ;;  %s915_s19 = sld [smem:[#allocation4 + $0x9]]  ;;  %s1511_s1 = sld [smem:[#allocation4 + $0xa]] }
  0x34   : > { %1045 = vset.pattern.permute.xlu1 %v1245_v3  ;;  %1043 = vset.pattern.permute.xlu0 %v1246_v4  ;;  %v300_v3 = vstv %s1458_s9  ;;  %s1515_s26 = sld [smem:[#allocation4 + $0xb]]  ;;  %s918_s28 = sld [smem:[#allocation4 + $0xc]] }
  0x35   : > { %345 = vperm.xlu1 %1045, %v1393_v2   ;;  %317 = vperm.xlu0 %1043, %v1393_v2   ;;  %v1433_v35 = vsub.s32 0, %v307_v34  ;;  %v1435_v36 = vsub.s32 2, %v307_v34  ;;  %v1442_v39 = vsub.s32 1, %v307_v34  ;;  %v1444_v40 = vsub.s32 3, %v307_v34  ;;  %s1523_s8 = sld [smem:[#allocation4 + $0xd]]  ;;  %s1530_s9 = sld [smem:[#allocation4 + $0xe]] }
  0x36   : > { %v1452_v47 = vsub.s32 4, %v307_v34  ;;  %v1454_v48 = vsub.s32 5, %v307_v34  ;;  %v1464_v56 = vsub.s32 6, %v307_v34  ;;  %v1480_v0 = vsub.s32 7, %v307_v34 }
  0x37   : > { %v309_v38 = vrot.slane %v1438_v37, %v1433_v35  ;;  %v337_v42 = vrot.slane %v1438_v37, %v1435_v36  ;;  %v323_v45 = vrot.slane %v1438_v37, %v1442_v39  ;;  %v351_v46 = vrot.slane %v1438_v37, %v1444_v40 }
  0x38   : > { %v365_v54 = vrot.slane %v1438_v37, %v1452_v47  ;;  %v379_v55 = vrot.slane %v1438_v37, %v1454_v48  ;;  %v393_v63 = vrot.slane %v1438_v37, %v1464_v56 }
  0x39   : > { %1046 = vset.pattern.permute.xlu1 %v1247_v5  ;;  %1047 = vset.pattern.permute.xlu0 %v1248_v6 }
  0x3a   : > { %359 = vperm.xlu1 %1046, %v1393_v2   ;;  %373 = vperm.xlu0 %1047, %v1393_v2  }
  0x3e   : > { %1048 = vset.pattern.permute.xlu1 %v1249_v7  ;;  %1050 = vset.pattern.permute.xlu0 %v1250_v8  ;;  %v327_v8 = vstv %s1466_s10  ;;  %s921_s10 = sld [smem:[#allocation4 + $0xf]] }
  0x3f   : > { %387 = vperm.xlu1 %1048, %v1393_v2   ;;  %415 = vperm.xlu0 %1050, %v1393_v2  }
  0x43   : > { %1049 = vset.pattern.permute.xlu1 %v1251_v9  ;;  %1053 = vset.pattern.permute.xlu0 %v1252_v10  ;;  %v407_v9 = vrot.slane %v1438_v37, %v1480_v0 }
  0x44   : > { %401 = vperm.xlu1 %1049, %v1393_v2   ;;  %457 = vperm.xlu0 %1053, %v1393_v2  }
  0x48   : > { %1051 = vset.pattern.permute.xlu1 %v1253_v11  ;;  %1056 = vset.pattern.permute.xlu0 %v1254_v12 }
  0x49   : > { %429 = vperm.xlu1 %1051, %v1393_v2   ;;  %499 = vperm.xlu0 %1056, %v1393_v2  }
  0x4d   : > { %1052 = vset.pattern.permute.xlu1 %v1255_v13  ;;  %1059 = vset.pattern.permute.xlu0 %v1256_v14  ;;  %v341_v14 = vstv %s1468_s11  ;;  %s922_s11 = sld [smem:[#allocation4 + $0x10]] }
  0x4e   : > { %443 = vperm.xlu1 %1052, %v1393_v2   ;;  %541 = vperm.xlu0 %1059, %v1393_v2  }
  0x52   : > { %1054 = vset.pattern.permute.xlu1 %v1257_v15  ;;  %1062 = vset.pattern.permute.xlu0 %v1258_v16 }
  0x53   : > { %471 = vperm.xlu1 %1054, %v1393_v2   ;;  %583 = vperm.xlu0 %1062, %v1393_v2  }
  0x57   : > { %1055 = vset.pattern.permute.xlu1 %v1259_v17  ;;  %1065 = vset.pattern.permute.xlu0 %v1260_v18  ;;  %v355_v18 = vstv %s1476_s12  ;;  %s1540_s12 = sld [smem:[#allocation4 + $0x11]] }
  0x58   : > { %485 = vperm.xlu1 %1055, %v1393_v2   ;;  %625 = vperm.xlu0 %1065, %v1393_v2  }
  0x5c   : > { %1057 = vset.pattern.permute.xlu1 %v1261_v19  ;;  %1068 = vset.pattern.permute.xlu0 %v1262_v20  ;;  %v369_v19 = vstv %s1478_s13  ;;  %s924_s13 = sld [smem:[#allocation4 + $0x12]] }
  0x5d   : > { %513 = vperm.xlu1 %1057, %v1393_v2   ;;  %667 = vperm.xlu0 %1068, %v1393_v2  }
  0x61   : > { %1058 = vset.pattern.permute.xlu1 %v1263_v21  ;;  %1071 = vset.pattern.permute.xlu0 %v1264_v22 }
  0x62   : > { %527 = vperm.xlu1 %1058, %v1393_v2   ;;  %709 = vperm.xlu0 %1071, %v1393_v2  }
  0x66   : > { %1060 = vset.pattern.permute.xlu1 %v1265_v23  ;;  %1074 = vset.pattern.permute.xlu0 %v1266_v24  ;;  %v435_v23 = vrot.slane %v1471_v61, %v1442_v39 }
  0x67   : > { %555 = vperm.xlu1 %1060, %v1393_v2  }
  0x6b   : > { %1061 = vset.pattern.permute.xlu1 %v1267_v25  ;;  %v383_v25 = vstv %s1485_s14  ;;  %s1547_s14 = sld [smem:[#allocation4 + $0x13]] }
  0x6c   : > { %569 = vperm.xlu1 %1061, %v1393_v2  }
  0x70   : > { %1063 = vset.pattern.permute.xlu1 %v1268_v26 }
  0x71   : > { %597 = vperm.xlu1 %1063, %v1393_v2  }
  0x75   : > { %1064 = vset.pattern.permute.xlu1 %v1269_v27 }
  0x76   : > { %611 = vperm.xlu1 %1064, %v1393_v2  }
  0x7a   : > { %1066 = vset.pattern.permute.xlu1 %v1270_v28 }
  0x7b   : > { %639 = vperm.xlu1 %1066, %v1393_v2  }
  0x7f   : > { %1067 = vset.pattern.permute.xlu1 %v1271_v29 }
  0x80   : > { %653 = vperm.xlu1 %1067, %v1393_v2  }
  0x84   : > { %1069 = vset.pattern.permute.xlu1 %v1272_v30  ;;  %v463_v30 = vrot.slane %v1471_v61, %v1444_v40 }
  0x85   : > { %681 = vperm.xlu1 %1069, %v1393_v2  }
  0x89   : > { %1070 = vset.pattern.permute.xlu1 %v1273_v31 }
  0x8a   : > { %695 = vperm.xlu1 %1070, %v1393_v2  }
  0x8e   : > { %1072 = vset.pattern.permute.xlu1 %v1274_v32 }
  0x8f   : > { %723 = vperm.xlu1 %1072, %v1393_v2  }
  0x93   : > { %1073 = vset.pattern.permute.xlu1 %v1266_v24 }
  0x94   : > { %737 = vperm.xlu1 %1073, %v1393_v2   ;;  %v421_v2 = vrot.slane %v1471_v61, %v1433_v35 }
  0xaf   : > { %v332_v41 = vpop.permute.xlu1 %331  ;;  %v304_v43 = vpop.permute.xlu0 %303 }
  0xb0   : > { %v310_v44 = vadd.f32 %v309_v38, %v304_v43  ;;  %v338_v49 = vadd.f32 %v337_v42, %v332_v41  ;;  %v397_v38 = vstv %s1491_s16  ;;  %v449_v41 = vrot.slane %v1471_v61, %v1435_v36  ;;  %s1551_s16 = sld [smem:[#allocation4 + $0x14]] }
  0xb2   : > { %1075 = vtanh.f32 %v310_v44 }
  0xb3   : > { %1077 = vtanh.f32 %v338_v49 }
  0xb4   : > { %v346_v50 = vpop.permute.xlu1 %345  ;;  %v318_v51 = vpop.permute.xlu0 %317 }
  0xb5   : > { %v324_v52 = vadd.f32 %v323_v45, %v318_v51  ;;  %v352_v53 = vadd.f32 %v351_v46, %v346_v50  ;;  %v411_v50 = vstv %s1498_s17  ;;  %s927_s17 = sld [smem:[#allocation4 + $0x15]] }
  0xb7   : > { %1079 = vtanh.f32 %v324_v52 }
  0xb8   : > { %1081 = vtanh.f32 %v352_v53  ;;  %v477_v53 = vrot.slane %v1471_v61, %v1452_v47 }
  0xb9   : > { %v360_v57 = vpop.permute.xlu1 %359  ;;  %v374_v58 = vpop.permute.xlu0 %373 }
  0xba   : > { %v366_v59 = vadd.f32 %v365_v54, %v360_v57  ;;  %v380_v60 = vadd.f32 %v379_v55, %v374_v58  ;;  %v425_v55 = vstv %s1502_s18  ;;  %s928_s18 = sld [smem:[#allocation4 + $0x16]] }
  0xbc   : > { %1083 = vtanh.f32 %v366_v59  ;;  %v1076_v1 = vpop.eup %1075  ;;  %v505_v59 = vrot.slane %v1471_v61, %v1464_v56 }
  0xbd   : > { %1085 = vtanh.f32 %v380_v60  ;;  %v314_v4 = vmul.f32 %v1076_v1, %v313_v62  ;;  %v1078_v10 = vpop.eup %1077 }
  0xbe   : > { %v388_v5 = vpop.permute.xlu1 %387  ;;  %v416_v6 = vpop.permute.xlu0 %415  ;;  %v342_v21 = vmul.f32 %v1078_v10, %v341_v14  ;;  %v453_v10 = vstv %s1511_s1  ;;  %s931_s1 = sld [smem:[#allocation4 + $0x19]] }
  0xbf   : > { %v394_v7 = vadd.f32 %v393_v63, %v388_v5  ;;  %v315_v11 = vadd.f32 %v314_v4, %v300_v3  ;;  %v422_v12 = vadd.f32 %v421_v2, %v416_v6  ;;  %v439_v3 = vstv %s915_s19  ;;  %s930_s19 = sld [smem:[#allocation4 + $0x18]] }
  0xc0   : > { %v491_v4 = vrot.slane %v1471_v61, %v1454_v48 }
  0xc1   : > { %1087 = vtanh.f32 %v394_v7  ;;  %v1080_v13 = vpop.eup %1079 }
  0xc2   : > { %v328_v15 = vmul.f32 %v1080_v13, %v327_v8  ;;  %v1082_v17 = vpop.eup %1081  ;;  %1089 = vtanh.f32 %v422_v12  ;;  %v519_v13 = vrot.slane %v1471_v61, %v1480_v0 }
  0xc3   : > { %v402_v16 = vpop.permute.xlu1 %401  ;;  %v356_v27 = vmul.f32 %v1082_v17, %v355_v18  ;;  %v458_v32 = vpop.permute.xlu0 %457 }
  0xc4   : > { %v408_v20 = vadd.f32 %v407_v9, %v402_v16  ;;  %v329_v22 = vadd.f32 %v328_v15, %v315_v11  ;;  %v464_v44 = vadd.f32 %v463_v30, %v458_v32  ;;  %v467_v15 = vstv %s1515_s26  ;;  %v1526_v16 = vld [vmem:[%s1431_s30 + $0x10] sm:$0xff]  ;;  %s932_s26 = sld [smem:[#allocation4 + $0x1a]] }
  0xc6   : > { %v1084_v24 = vpop.eup %1083  ;;  %1091 = vtanh.f32 %v408_v20  ;;  %v343_v28 = vadd.f32 %v342_v21, %v329_v22 }
  0xc7   : > { %v1086_v26 = vpop.eup %1085  ;;  %v370_v29 = vmul.f32 %v1084_v24, %v369_v19  ;;  %v547_v19 = vrot.slane %v1526_v16, %v1442_v39  ;;  %v481_v24 = vstv %s918_s28  ;;  %s933_s28 = sld [smem:[#allocation4 + $0x1b]] }
  0xc8   : > { %v430_v31 = vpop.permute.xlu1 %429  ;;  %v357_v33 = vadd.f32 %v356_v27, %v343_v28  ;;  %v384_v34 = vmul.f32 %v1086_v26, %v383_v25  ;;  %v500_v62 = vpop.permute.xlu0 %499  ;;  %v533_v25 = vrot.slane %v1526_v16, %v1433_v35 }
  0xc9   : > { %v436_v37 = vadd.f32 %v435_v23, %v430_v31  ;;  %v506_v6 = vadd.f32 %v505_v59, %v500_v62  ;;  %v495_v31 = vstv %s1523_s8  ;;  %v537_v59 = vstv %s922_s11  ;;  %s934_s8 = sld [smem:[#allocation4 + $0x1c]]  ;;  %s937_s11 = sld [smem:[#allocation4 + $0x1f]] }
  0xca   : > { %v371_v43 = vadd.f32 %v370_v29, %v357_v33 }
  0xcb   : > { %v1088_v42 = vpop.eup %1087  ;;  %1093 = vtanh.f32 %v436_v37 }
  0xcc   : > { %v385_v45 = vadd.f32 %v384_v34, %v371_v43  ;;  %v398_v46 = vmul.f32 %v1088_v42, %v397_v38  ;;  %v1090_v52 = vpop.eup %1089  ;;  %1095 = vtanh.f32 %v464_v44  ;;  %v561_v34 = vrot.slane %v1526_v16, %v1435_v36 }
  0xcd   : > { %v444_v49 = vpop.permute.xlu1 %443  ;;  %v426_v1 = vmul.f32 %v1090_v52, %v425_v55  ;;  %v542_v21 = vpop.permute.xlu0 %541  ;;  %v509_v38 = vstv %s1530_s9  ;;  %v589_v43 = vrot.slane %v1526_v16, %v1452_v47  ;;  %v575_v52 = vrot.slane %v1526_v16, %v1444_v40  ;;  %s935_s9 = sld [smem:[#allocation4 + $0x1d]] }
  0xce   : > { %v450_v51 = vadd.f32 %v449_v41, %v444_v49  ;;  %v399_v57 = vadd.f32 %v398_v46, %v385_v45  ;;  %v548_v27 = vadd.f32 %v547_v19, %v542_v21 }
  0xd0   : > { %v1092_v54 = vpop.eup %1091  ;;  %1097 = vtanh.f32 %v450_v51  ;;  %v523_v51 = vstv %s921_s10  ;;  %s936_s10 = sld [smem:[#allocation4 + $0x1e]] }
  0xd1   : > { %v412_v58 = vmul.f32 %v1092_v54, %v411_v50 }
  0xd2   : > { %v472_v60 = vpop.permute.xlu1 %471  ;;  %v584_v45 = vpop.permute.xlu0 %583 }
  0xd3   : > { %v413_v63 = vadd.f32 %v412_v58, %v399_v57  ;;  %v478_v2 = vadd.f32 %v477_v53, %v472_v60  ;;  %v590_v54 = vadd.f32 %v589_v43, %v584_v45 }
  0xd5   : > { %v1094_v5 = vpop.eup %1093  ;;  %1099 = vtanh.f32 %v478_v2  ;;  %v427_v7 = vadd.f32 %v426_v1, %v413_v63  ;;  %v603_v63 = vrot.slane %v1526_v16, %v1454_v48  ;;  %v551_v2 = vstv %s1540_s12 }
  0xd6   : > { %v440_v8 = vmul.f32 %v1094_v5, %v439_v3  ;;  %v1096_v12 = vpop.eup %1095  ;;  %1101 = vtanh.f32 %v506_v6  ;;  %v631_v5 = vrot.slane %v1526_v16, %v1480_v0 }
  0xd7   : > { %v486_v9 = vpop.permute.xlu1 %485  ;;  %v468_v23 = vmul.f32 %v1096_v12, %v467_v15  ;;  %v617_v12 = vrot.slane %v1526_v16, %v1464_v56  ;;  %v1556_v15 = vld [vmem:[%s1431_s30 + $0x18] sm:$0xff]  ;;  %s1564_s30 = sld [smem:[#allocation4 + $0x17]] }
  0xd8   : > { %v492_v11 = vadd.f32 %v491_v4, %v486_v9  ;;  %v441_v17 = vadd.f32 %v440_v8, %v427_v7  ;;  %v626_v7 = vpop.permute.xlu0 %625 }
  0xda   : > { %v1098_v14 = vpop.eup %1097  ;;  %1103 = vtanh.f32 %v492_v11  ;;  %v565_v11 = vstv %s924_s13 }
  0xdb   : > { %v454_v18 = vmul.f32 %v1098_v14, %v453_v10  ;;  %v632_v14 = vadd.f32 %v631_v5, %v626_v7  ;;  %v677_v5 = vstv %s932_s26 }
  0xdc   : > { %v514_v20 = vpop.permute.xlu1 %513 }
  0xdd   : > { %v455_v22 = vadd.f32 %v454_v18, %v441_v17  ;;  %v520_v61 = vadd.f32 %v519_v13, %v514_v20  ;;  %v579_v20 = vstv %s1547_s14  ;;  %s293_s14 = scalar_lea.vmem %s1643_s4, %s1387_s15 }
  0xdf   : > { %v1100_v26 = vpop.eup %1099  ;;  %1105 = vtanh.f32 %v520_v61  ;;  %v469_v28 = vadd.f32 %v468_v23, %v455_v22  ;;  %v645_v23 = vrot.slane %v1556_v15, %v1433_v35  ;;  %v659_v35 = vrot.slane %v1556_v15, %v1442_v39 }
  0xe0   : > { %v482_v29 = vmul.f32 %v1100_v26, %v481_v24  ;;  %v1102_v33 = vpop.eup %1101  ;;  %1107 = vtanh.f32 %v548_v27  ;;  %v593_v24 = vstv %s1551_s16  ;;  %v673_v26 = vrot.slane %v1556_v15, %v1435_v36  ;;  %s276_s16 = sand.u32 1, %s1224_s21  }
  0xe1   : > { %v528_v30 = vpop.permute.xlu1 %527  ;;  %v510_v49 = vmul.f32 %v1102_v33, %v509_v38  ;;  %v621_v36 = vstv %s928_s18  ;;  %s940_s18 = sshll.u32 %s1232_s23, 7  ;;  %s1275_s23 = smov [#allocation7]  }
  0xe2   : > { %v534_v32 = vadd.f32 %v533_v25, %v528_v30  ;;  %v483_v41 = vadd.f32 %v482_v29, %v469_v28  ;;  %v668_v28 = vpop.permute.xlu0 %667  ;;  %s1591_s26 = scalar_lea.hbm %s1644_s5, %s940_s18 }
  0xe4   : > { %v1104_v37 = vpop.eup %1103  ;;  %1109 = vtanh.f32 %v534_v32  ;;  %v607_v32 = vstv %s927_s17  ;;  %s903_s17 = sshll.u32 %s276_s16, 3 }
  0xe5   : > { %v496_v42 = vmul.f32 %v1104_v37, %v495_v31 }
  0xe6   : > { %v556_v44 = vpop.permute.xlu1 %555 }
  0xe7   : > { %v497_v46 = vadd.f32 %v496_v42, %v483_v41  ;;  %v562_v50 = vadd.f32 %v561_v34, %v556_v44  ;;  %v674_v34 = vadd.f32 %v673_v26, %v668_v28  ;;  %v687_v44 = vrot.slane %v1556_v15, %v1444_v40 }
  0xe9   : > { %v1106_v53 = vpop.eup %1105  ;;  %1111 = vtanh.f32 %v562_v50  ;;  %v511_v55 = vadd.f32 %v510_v49, %v497_v46  ;;  %v635_v46 = vstv %s1564_s30  ;;  %v715_v50 = vrot.slane %v1556_v15, %v1454_v48  ;;  %s278_s30 = scalar_lea.vmem [#allocation7], %s903_s17 }
  0xea   : > { %v524_v57 = vmul.f32 %v1106_v53, %v523_v51  ;;  %v1108_v62 = vpop.eup %1107  ;;  %1113 = vtanh.f32 %v590_v54  ;;  %s792_s15 = sshll.u32 %s278_s30, 4  ;;  %s1593_s15 = int_to_ptr.vmem [resolvable:$true] %s792_s15 }
  0xeb   : > { %v570_v58 = vpop.permute.xlu1 %569  ;;  %v552_v9 = vmul.f32 %v1108_v62, %v551_v2 }
  0xec   : > { %v576_v60 = vadd.f32 %v575_v52, %v570_v58  ;;  %v525_v3 = vadd.f32 %v524_v57, %v511_v55  ;;  %v710_v52 = vpop.permute.xlu0 %709  ;;  %v649_v57 = vstv %s930_s19  ;;  %v701_v58 = vrot.slane %v1556_v15, %v1452_v47 }
  0xee   : > { %v1110_v1 = vpop.eup %1109  ;;  %1115 = vtanh.f32 %v576_v60 }
  0xef   : > { %v538_v4 = vmul.f32 %v1110_v1, %v537_v59  ;;  %v716_v59 = vadd.f32 %v715_v50, %v710_v52  ;;  %v663_v1 = vstv %s931_s1 }
  0xf0   : > { %v598_v6 = vpop.permute.xlu1 %597 }
  0xf1   : > { %v539_v8 = vadd.f32 %v538_v4, %v525_v3  ;;  %v604_v10 = vadd.f32 %v603_v63, %v598_v6  ;;  %v729_v3 = vrot.slane %v1556_v15, %v1464_v56 }
  0xf3   : > { %v1112_v13 = vpop.eup %1111  ;;  %1117 = vtanh.f32 %v604_v10  ;;  %v553_v17 = vadd.f32 %v552_v9, %v539_v8 }
  0xf4   : > { %v566_v18 = vmul.f32 %v1112_v13, %v565_v11  ;;  %v1114_v22 = vpop.eup %1113  ;;  %1119 = vtanh.f32 %v632_v14  ;;  %v691_v11 = vstv %s933_s28  ;;  %s778_s28 = scalar_lea.sflag [#allocation5], %s276_s16 }
  0xf5   : > { %v612_v19 = vpop.permute.xlu1 %611  ;;  %v594_v30 = vmul.f32 %v1114_v22, %v593_v24  ;;  %v719_v22 = vstv %s935_s9  ;;  %s1162_s9 = sshll.u32 %s1275_s23, 4  ;;  %s1163_s9 = int_to_ptr.vmem [resolvable:$false] %s1162_s9 }
  0xf6   : > { %v618_v21 = vadd.f32 %v617_v12, %v612_v19  ;;  %v567_v16 = vadd.f32 %v566_v18, %v553_v17  ;;  %v743_v12 = vrot.slane %v1556_v15, %v1480_v0  ;;  %v705_v19 = vstv %s934_s8  ;;  %s1158_s8 = scalar_lea.vmem %s1593_s15, 128  ;;  %p1165_p0 = scmp.lt.s32.totalorder %s1593_s15, %s1163_s9 }
  0xf7   : > { %p1159_p10 = scmp.ne.s32.totalorder %s1593_s15, %s1158_s8 }
  0xf8   : > { %v1116_v61 = vpop.eup %1115  ;;  %1121 = vtanh.f32 %v618_v21 }
  0xf9   : > { %v580_v25 = vmul.f32 %v1116_v61, %v579_v20  ;;  %p1160_p11 = pnand %p1159_p10, %p1349_p4 }
  0xfa   : > { %v640_v27 = vpop.permute.xlu1 %639 }
  0xfb   : > { %v581_v29 = vadd.f32 %v580_v25, %v567_v16  ;;  %v646_v31 = vadd.f32 %v645_v23, %v640_v27  ;;  %v733_v25 = vstv %s936_s10  ;;  %v747_v27 = vstv %s937_s11  ;;  %p1161_p13 = pneg %p1160_p11  ;;  %s1164_s10 = scalar_lea.vmem %s1163_s9, 256 }
  0xfc   : > { %p1166_p1 = scmp.lt.s32.totalorder %s1164_s10, %s1158_s8 }
  0xfd   : > { %v1118_v33 = vpop.eup %1117  ;;  %1123 = vtanh.f32 %v646_v31  ;;  %v595_v37 = vadd.f32 %v594_v30, %v581_v29 }
  0xfe   : > { %v608_v38 = vmul.f32 %v1118_v33, %v607_v32  ;;  %v1120_v43 = vpop.eup %1119  ;;  %1125 = vtanh.f32 %v674_v34  ;;  %p1167_p2 = por %p1166_p1, %p1165_p0 }
  0xff   : > { %v654_v41 = vpop.permute.xlu1 %653  ;;  %v636_v54 = vmul.f32 %v1120_v43, %v635_v46 }
 0x100   : > { %v660_v42 = vadd.f32 %v659_v35, %v654_v41  ;;  %v609_v49 = vadd.f32 %v608_v38, %v595_v37  ;;  %v938_v37 = vld [vmem:[%s293_s14] ss:$0 sm:$0xff]  ;;  %p1168_p3 = pnand %p1167_p2, %p1161_p13 }
 0x102   : > { %v1122_v45 = vpop.eup %1121  ;;  %1127 = vtanh.f32 %v660_v42 }
 0x103   : > { %v622_v39 = vmul.f32 %v1122_v45, %v621_v36 }
 0x104   : > { %v682_v51 = vpop.permute.xlu1 %681 }
 0x105   : > { %v623_v53 = vadd.f32 %v622_v39, %v609_v49  ;;  %v688_v55 = vadd.f32 %v687_v44, %v682_v51 }
 0x107   : > { %v1124_v40 = vpop.eup %1123  ;;  %1129 = vtanh.f32 %v688_v55  ;;  %v637_v60 = vadd.f32 %v636_v54, %v623_v53 }
 0x108   : > { %v650_v62 = vmul.f32 %v1124_v40, %v649_v57  ;;  %v1126_v48 = vpop.eup %1125  ;;  %1131 = vtanh.f32 %v716_v59 }
 0x109   : > { %v696_v63 = vpop.permute.xlu1 %695  ;;  %v678_v9 = vmul.f32 %v1126_v48, %v677_v5 }
 0x10a   : > { %v702_v2 = vadd.f32 %v701_v58, %v696_v63  ;;  %v651_v6 = vadd.f32 %v650_v62, %v637_v60 }
 0x10c   : > { %v1128_v4 = vpop.eup %1127  ;;  %1133 = vtanh.f32 %v702_v2 }
 0x10d   : > { %v664_v47 = vmul.f32 %v1128_v4, %v663_v1 }
 0x10e   : > { %v724_v7 = vpop.permute.xlu1 %723 }
 0x10f   : > { %v665_v8 = vadd.f32 %v664_v47, %v651_v6  ;;  %v730_v10 = vadd.f32 %v729_v3, %v724_v7 }
 0x111   : > { %v1130_v13 = vpop.eup %1129  ;;  %1135 = vtanh.f32 %v730_v10  ;;  %v679_v17 = vadd.f32 %v678_v9, %v665_v8 }
 0x112   : > { %v692_v14 = vmul.f32 %v1130_v13, %v691_v11  ;;  %v1132_v20 = vpop.eup %1131 }
 0x113   : > { %v738_v56 = vpop.permute.xlu1 %737  ;;  %v720_v16 = vmul.f32 %v1132_v20, %v719_v22 }
 0x114   : > { %v744_v18 = vadd.f32 %v743_v12, %v738_v56  ;;  %v693_v23 = vadd.f32 %v692_v14, %v679_v17 }
 0x116   : > { %v1134_v21 = vpop.eup %1133  ;;  %1137 = vtanh.f32 %v744_v18 }
 0x117   : > { %v706_v61 = vmul.f32 %v1134_v21, %v705_v19 }
 0x119   : > { %v707_v24 = vadd.f32 %v706_v61, %v693_v23 }
 0x11b   : > { %v1136_v0 = vpop.eup %1135  ;;  %v721_v15 = vadd.f32 %v720_v16, %v707_v24 }
 0x11c   : > { %v734_v26 = vmul.f32 %v1136_v0, %v733_v25 }
 0x11e   : > { %v735_v29 = vadd.f32 %v734_v26, %v721_v15 }
 0x120   : > { %v1138_v28 = vpop.eup %1137 }
 0x121   : > { %v748_v30 = vmul.f32 %v1138_v28, %v747_v27 }
 0x123   : > { %v749_v31 = vadd.f32 %v748_v30, %v735_v29 }
 0x125   : > { %v751_v32 = vsel %vm750_vm0, %v749_v31, -inf }
 0x126   : > { %752 = vmax.xlane.f32.xlu0 %v751_v32 }
 0x1b3   : > { %v753_v35 = vpop.xlane.xlu0 %752 }
 0x1b4   : > { %v754_v33 = vsub.f32 %v749_v31, %v753_v35 }
 0x1b6   : > { %v755_v34 = vmul.f32 1.442695, %v754_v33 }
 0x1b8   : > { %1139 = vpow2.f32 %v755_v34 }
 0x1c2   : > { %v1140_v38 = vpop.eup %1139 }
 0x1c3   : > { %v757_v41 = vsel %vm750_vm0, %v1140_v38, 0.0  ;;  %v767_v36 = vmul.f32 %v1140_v38, %v938_v37 }
 0x1c4   : > { %758 = vadd.xlane.f32.xlu1 %v757_v41 }
 0x1c5   : > { %v768_v42 = vsel %vm750_vm0, %v767_v36, 0.0 }
 0x1c6   : > { %769 = vadd.xlane.f32.xlu0 %v768_v42 }
 0x251   : > { %v759_v43 = vpop.xlane.xlu1 %758 }
 0x252   : > { %v771_v44 = vmul.f32 1e-08, %v759_v43 }
 0x253   : > { %v770_v45 = vpop.xlane.xlu0 %769 }
 0x254   : > { %v772_v46 = vadd.f32 %v771_v44, %v770_v45 }
 0x256   : > { %1141 = vrcp.f32 %v772_v46 }
 0x260   : > { %v1142_v49 = vpop.eup %1141 }
 0x261   : > { %v775_v39 = vmul.f32 %v1142_v49, %v767_v36 }
 0x263   : > { %776 = vst.msk [vmem:[%s278_s30] sm:$0xff] %vm750_vm0, %v775_v39 }
 0x264   : > { %1171 = shalt.err (!%p1168_p3)
}
 0x265   : > { %s1172_s11 = scalar_lea.hbm %s1591_s26, 128  ;;  %s1176_s14 = scalar_lea.hbm %s1644_s5, 256 }
 0x266   : > { %p1173_p5 = scmp.ne.s32.totalorder %s1591_s26, %s1172_s11  ;;  %p1177_p9 = scmp.lt.u32.totalorder %s1591_s26, %s1644_s5 }
 0x267   : > { %p1178_p12 = scmp.lt.u32.totalorder %s1176_s14, %s1172_s11  ;;  %p1180_p11 = scmp.lt.u32.totalorder %s1172_s11, %s1591_s26 }
 0x268   : > { %p1174_p6 = pnand %p1173_p5, %p1349_p4 }
 0x269   : > { %p1179_p10 = por %p1178_p12, %p1177_p9 }
 0x26a   : > { %p1175_p7 = pneg %p1174_p6 }
 0x26b   : > { %p1181_p13 = por %p1180_p11, %p1179_p10 }
 0x26d   : > { %p1182_p0 = pnand %p1181_p13, %p1175_p7 }
 0x26f   : > { %1185 = shalt.err (!%p1182_p0)
}
 0x270   : > { %948 = dma.vmem_to_hbm [thread:$0]  (%p1349_p4), %s1593_s15, 128, %s1591_s26, %s778_s28  }
 0x271 PF: > { %p960_p1 = scmp.ge.s32.totalorder %s1240_s25, 2  ;;  %s804_s18 = sand.u32 1, %s1220_s20  }
 0x272   : > { %s805_s30 = scalar_lea.sflag [#allocation5], %s804_s18 }
 0x273   : > { %p955_p2 = pnand %p960_p1, %p1356_p8 }
 0x275   : > { %1215 = dma.done.wait (!%p955_p2), %s805_s30, 128  }
 0x276   : > { %1217 = vsyncadd (!%p955_p2), %s805_s30, 4294967168  ;;  %s20_s25 = sadd.s32 1, %s1240_s25   ;;  %s1649_s20 = smov %s1224_s21 }
 0x277   : > { %p17_p3 = scmp.ge.s32.totalorder %s20_s25, 4   ;;  %s1650_s21 = smov %s1228_s22 }
 0x278   : > { %s1651_s22 = smov %s1362_s7  ;;  %s1652_s23 = smov %s1236_s24 }
 0x279   : > { %s1653_s24 = smov %s1655_s27  ;;  %19 = sbr.rel (!%p17_p3) target bundleno = 7 (0x7), region = 86 }
 0x280   :  { %810 = vsyncpa [#allocation5], 1 }
 0x281   :  { %812 = vsyncpa [#allocation5 + $0x1], 1 }
 0x282   :  { %813 = vsyncpa [#allocation6], 1 }
 0x283   :  { %815 = vsyncpa [#allocation6 + $0x1], 1 }

</bundles_post_ra>
